<compile_context>
chip_gen: v7x
topology: tpu7x:2x2x1
jax: 0.10.0
libtpu: 0.0.40
codegen_flags: <defaults>
</compile_context>

<pallas_src>
import functools

import jax
import jax.numpy as jnp
from jax.experimental import pallas as pl
from jax.experimental.pallas import tpu as pltpu


# ---------------------------------------------------------------------------
# Pallas kernel: fused [ec | convT(dc)] matmul + mask gating + LeakyReLU.
# ---------------------------------------------------------------------------
def _reverse_attention_kernel(p_ref,   # (TM, Kext)      bf16  [im2col(dc) | phase(ec)]
                              w_ref,   # (Kext, 4*Ctot)  bf16  fused convT + identity weight
                              m_ref,   # (TM, 4*Ctot)    bf16  phase-layout attention masks
                              o_ref,   # (TM, 4*Ctot)    f32
                              *, neg_slope):
    y = jnp.dot(p_ref[...], w_ref[...], preferred_element_type=jnp.float32)
    y = y * m_ref[...].astype(jnp.float32)
    o_ref[...] = jnp.maximum(y, neg_slope * y)       # LeakyReLU (0 < neg_slope < 1)


# ---------------------------------------------------------------------------
# Layout helpers (pure XLA data movement, fused into the surrounding jit).
# ---------------------------------------------------------------------------
def _im2col_3x3(x):
    """x: (N, C, H, W) -> (N*H*W, C*9); 3x3 windows of the 1-padded input, row-major (C,dr,dc)."""
    N, C, H, W = x.shape
    xp = jnp.pad(x, ((0, 0), (0, 0), (1, 1), (1, 1)))
    cols = [xp[:, :, dr:dr + H, dc:dc + W] for dr in range(3) for dc in range(3)]
    p = jnp.stack(cols, axis=0).reshape(3, 3, N, C, H, W)
    p = p.transpose(2, 4, 5, 3, 0, 1)                # (N, H, W, C, 3, 3)
    return p.reshape(N * H * W, C * 9)


def _space_to_phase(x):
    """(N, C, 2H, 2W) -> (N*H*W, 4*C), column = p*C + c with p = 2*(oh%2) + (ow%2)."""
    N, C, OH, OW = x.shape
    H, W = OH // 2, OW // 2
    y = x.reshape(N, C, H, 2, W, 2).transpose(0, 2, 4, 3, 5, 1)   # (N,H,W,ro,rw,C)
    return y.reshape(N * H * W, 4 * C)


def _phase_to_space(y, N, H, W, C):
    """(N*H*W, 4*C) -> (N, C, 2H, 2W)."""
    y = y.reshape(N, H, W, 2, 2, C).transpose(0, 5, 1, 3, 2, 4)   # (N,C,H,ro,W,rw)
    return y.reshape(N, C, 2 * H, 2 * W)


def _build_fused_weight(w, cec):
    """ConvTranspose2d weight (Cin, Cout, 4, 4) -> fused (Cin*9 + 4*Cec, 4*(Cec+Cout)).

    Column block for phase p = 2*ro+rw holds [ec channels | dc channels].  The conv rows use
    the phase decomposition: window position (dr,dc)=(ro+a, rw+b) multiplies kernel tap
    kh = 3-ro-2a, kw = 3-rw-2b (from oh = 2*ih - 1 + kh).  The ec rows are an identity
    pass-through placing ec phase p / channel c into output column p*Ctot + c."""
    Cin, Cout = w.shape[0], w.shape[1]
    ctot = cec + Cout
    wa = jnp.zeros((Cin, 3, 3, 4, Cout), dtype=jnp.float32)
    for ro in range(2):
        for rw in range(2):
            p = 2 * ro + rw
            for a in range(2):
                for b in range(2):
                    kh = 3 - ro - 2 * a
                    kw = 3 - rw - 2 * b
                    wa = wa.at[:, ro + a, rw + b, p, :].set(w[:, :, kh, kw])
    wa = wa.reshape(Cin * 9, 4, Cout)

    wfull = jnp.zeros((Cin * 9 + 4 * cec, 4, ctot), dtype=jnp.float32)
    wfull = wfull.at[:Cin * 9, :, cec:].set(wa)                     # convT block
    eye = jnp.eye(cec, dtype=jnp.float32)
    for p in range(4):
        wfull = wfull.at[Cin * 9 + p * cec:Cin * 9 + (p + 1) * cec, p, :cec].set(eye)
    return wfull.reshape(Cin * 9 + 4 * cec, 4 * ctot)


# ---------------------------------------------------------------------------
# Generation-aware tiling.
# ---------------------------------------------------------------------------
def _vmem_capacity_bytes():
    try:
        return int(pltpu.get_tpu_info().vmem_capacity_bytes)
    except Exception:
        return 64 * 1024 * 1024      # conservative default (v7x per-TC VMEM)


def _choose_tile_m(M, row_bytes, budget_bytes, min_grid=2):
    """Largest multiple-of-8 tile that (a) fits the pipeline budget, (b) leaves at least
    `min_grid` grid steps (v7x: shard M over both TensorCores), and (c) divides M exactly
    so the wrapper never has to pad/copy the input streams."""
    cap = budget_bytes // max(row_bytes, 1)
    cap = max(8, min(1024, (cap // 8) * 8))
    if M >= 16 * min_grid:
        cap = min(cap, max(8, (M // (8 * min_grid)) * 8))
    tm_start = min(cap, (M // 8) * 8)
    for tm in range(tm_start, 7, -8):
        if M % tm == 0:
            return tm
    return max(8, min(cap, ((M + 7) // 8) * 8))      # fallback: needs padding


# ---------------------------------------------------------------------------
# Forward pass.
# ---------------------------------------------------------------------------
def reverse_attention(ec_features, dc_features, input_masks_attention, w_convT,
                      *, neg_slope=0.2):
    """ReverseAttention.forward (bn=False, activ='leaky', k=4, s=2, p=1, bias=False)."""
    # TODO(synk): bn=True (BatchNorm2d) and the relu/sigmoid/tanh/prelu activation options are
    # not implemented; the module defaults (bn=False, LeakyReLU(0.2)) are used.
    N, Cin, H, W = dc_features.shape
    Cout = w_convT.shape[1]
    Cec = ec_features.shape[1]
    Ctot = Cec + Cout
    M = N * H * W
    K9 = Cin * 9
    Kext = K9 + 4 * Cec
    C4 = 4 * Ctot

    # --- relayout: every kernel input stream is bf16 (halves HBM + relayout traffic) -------
    # TODO(synk): for large Cin the 9x-replicated im2col stream dominates; tile over (N, H)
    # with a one-row halo instead of materialising patches (irrelevant at Cin=4).
    patches = _im2col_3x3(dc_features.astype(jnp.bfloat16))                 # (M, Cin*9)
    ec_ph = _space_to_phase(ec_features.astype(jnp.bfloat16))               # (M, 4*Cec)
    p_ext = jnp.concatenate([patches, ec_ph], axis=1)                       # (M, Kext)
    mask_ph = _space_to_phase(input_masks_attention.astype(jnp.bfloat16))   # (M, 4*Ctot)
    w_ext = _build_fused_weight(w_convT, Cec).astype(jnp.bfloat16)          # (Kext, 4*Ctot)

    # --- tiling: divisor-of-M tile, >=2 grid steps, generation-aware VMEM budget -----------
    vmem_cap = _vmem_capacity_bytes()
    vmem_limit = int(min(vmem_cap // 2, 64 * 1024 * 1024))   # 64 MiB on v5e/v6e, 32 MiB on v7x
    w_bytes = 2 * Kext * C4 * 2                              # resident weight (2-buffer bound)
    row_bytes = 2 * (Kext * 2 + C4 * 2 + C4 * 4)             # double-buffered in/out per M row
    pipe_budget = max(vmem_limit // 3 - w_bytes, 256 * 1024)
    tm = _choose_tile_m(M, row_bytes, pipe_budget, min_grid=2)
    grid_m = pl.cdiv(M, tm)
    m_rows = grid_m * tm
    padded = m_rows != M
    if padded:                                               # rare fallback only
        pad = ((0, m_rows - M), (0, 0))
        p_ext = jnp.pad(p_ext, pad)
        mask_ph = jnp.pad(mask_ph, pad)

    kernel = functools.partial(_reverse_attention_kernel, neg_slope=neg_slope)

    flops = 2 * m_rows * Kext * C4 + 2 * m_rows * C4
    bytes_accessed = m_rows * (Kext * 2 + C4 * 2 + C4 * 4) + Kext * C4 * 2

    out_ph = pl.pallas_call(
        kernel,
        out_shape=jax.ShapeDtypeStruct((m_rows, C4), jnp.float32),
        grid=(grid_m,),
        in_specs=[
            pl.BlockSpec((tm, Kext), lambda i: (i, 0)),       # patches+ec (tiled over M)
            pl.BlockSpec((Kext, C4), lambda i: (0, 0)),       # fused weight (VMEM-resident)
            pl.BlockSpec((tm, C4), lambda i: (i, 0)),         # attention masks
        ],
        out_specs=pl.BlockSpec((tm, C4), lambda i: (i, 0)),
        compiler_params=pltpu.CompilerParams(
            dimension_semantics=("parallel",),                # v7x: shard M over both TCs
            vmem_limit_bytes=vmem_limit),
        cost_estimate=pl.CostEstimate(flops=int(flops), transcendentals=0,
                                      bytes_accessed=int(bytes_accessed)),
    )(p_ext, w_ext, mask_ph)

    if padded:
        out_ph = out_ph[:M]
    # Single phase->space transpose; per-phase channel order is already [ec | dc], i.e. the
    # torch.cat((ec_features, conv_dc_features), dim=1) order -> no concatenate needed.
    return _phase_to_space(out_ph, N, H, W, Ctot)


if __name__ == "__main__":
    key = jax.random.PRNGKey(0)
    k_ec, k_dc, k_mask, k_w = jax.random.split(key, 4)

    N = 2
    in_channels = 4      # dc_features channels (ConvTranspose2d in_channels)
    out_channels = 32    # ConvTranspose2d out_channels
    ec_channels = 32     # encoder skip channels
    H = W = 8            # low-res decoder spatial -> 16x16 output

    dc_features = jax.random.normal(k_dc, (N, in_channels, H, W), dtype=jnp.float32)
    ec_features = jax.random.normal(k_ec, (N, ec_channels, 2 * H, 2 * W), dtype=jnp.float32)
    input_masks_attention = jax.random.uniform(
        k_mask, (N, ec_channels + out_channels, 2 * H, 2 * W), dtype=jnp.float32)

    # weights_init('gaussian'): normal(0, 0.02); ConvTranspose2d weight (Cin, Cout, 4, 4), bias=False.
    w_convT = 0.02 * jax.random.normal(k_w, (in_channels, out_channels, 4, 4), dtype=jnp.float32)

    fwd = jax.jit(reverse_attention)
    out = jax.block_until_ready(fwd(ec_features, dc_features, input_masks_attention, w_convT))
    assert out.shape == (N, ec_channels + out_channels, 2 * H, 2 * W)

    # Reference (f32): ConvTranspose2d(k=4,s=2,p=1) == conv on the 2x-dilated input with the
    # spatially-flipped, (Cin,Cout)->(Cout,Cin)-transposed weight and padding k-1-p = 2.
    wf = jnp.transpose(jnp.flip(w_convT, axis=(2, 3)), (1, 0, 2, 3))
    conv_ref = jax.lax.conv_general_dilated(
        dc_features, wf, window_strides=(1, 1), padding=((2, 2), (2, 2)),
        lhs_dilation=(2, 2), dimension_numbers=("NCHW", "OIHW", "NCHW"))
    full = jnp.concatenate([ec_features, conv_ref], axis=1) * input_masks_attention
    ref = jnp.where(full >= 0.0, full, 0.2 * full)

    # bf16 input streams (ec / masks / dc / weights) -> validate with a 1e-2 mixed rel/abs
    # tolerance: the gating path error is provably <= ~2*2^-8 relative; the tiny conv-path
    # cancellation error is absorbed by atol.
    abs_err = jnp.abs(out - ref)
    ok = bool(jnp.all(abs_err <= 1e-2 + 1e-2 * jnp.abs(ref)))
    assert ok, f"mismatch: max abs err {float(jnp.max(abs_err))}"
    print("KERNEL_OK")
</pallas_src>

<mosaic_0001>
module attributes {stable_mosaic.version = 11 : i64} {
  func.func @_reverse_attention_kernel(%arg0: i32, %arg1: memref<64x164xbf16, #tpu.memory_space<vmem>>, %arg2: memref<164x256xbf16, #tpu.memory_space<vmem>>, %arg3: memref<64x256xbf16, #tpu.memory_space<vmem>>, %arg4: memref<64x256xf32, #tpu.memory_space<vmem>>) attributes {dimension_semantics = [#tpu.dimension_semantics<parallel>], iteration_bounds = array<i64: 2>, scalar_prefetch = 0 : i64, scratch_operands = 0 : i64, tpu.core_type = #tpu.core_type<tc>, window_params = [{transform_indices = @transform_0, window_bounds = array<i64: 64, 164>}, {pipeline_mode = #tpu.pipeline_mode<synchronous>, transform_indices = @transform_1, window_bounds = array<i64: 164, 256>}, {transform_indices = @transform_2, window_bounds = array<i64: 64, 256>}, {transform_indices = @transform_3, window_bounds = array<i64: 64, 256>}]} {
    %c0 = arith.constant 0 : index
    %c0_0 = arith.constant 0 : index
    %0 = vector.load %arg1[%c0, %c0_0] : memref<64x164xbf16, #tpu.memory_space<vmem>>, vector<64x164xbf16>
    %c0_1 = arith.constant 0 : index
    %c0_2 = arith.constant 0 : index
    %1 = vector.load %arg2[%c0_1, %c0_2] : memref<164x256xbf16, #tpu.memory_space<vmem>>, vector<164x256xbf16>
    %cst = arith.constant dense<0.000000e+00> : vector<64x256xf32>
    %2 = tpu.matmul %0, %1, %cst {dimension_numbers = #tpu.dot_dimension_numbers<[1], [0], [0], [1], [0, 0, 1, 1], [], []>} : vector<64x164xbf16>, vector<164x256xbf16>, vector<64x256xf32> -> vector<64x256xf32>
    %c0_3 = arith.constant 0 : index
    %c0_4 = arith.constant 0 : index
    %3 = vector.load %arg3[%c0_3, %c0_4] : memref<64x256xbf16, #tpu.memory_space<vmem>>, vector<64x256xbf16>
    %4 = arith.extf %3 : vector<64x256xbf16> to vector<64x256xf32>
    %5 = arith.mulf %2, %4 : vector<64x256xf32>
    %cst_5 = arith.constant 2.000000e-01 : f32
    %6 = vector.broadcast %cst_5 : f32 to vector<64x256xf32>
    %7 = arith.mulf %6, %5 : vector<64x256xf32>
    %8 = arith.maximumf %5, %7 : vector<64x256xf32>
    %c0_6 = arith.constant 0 : index
    %c0_7 = arith.constant 0 : index
    %9 = vector.load %arg4[%c0_6, %c0_7] : memref<64x256xf32, #tpu.memory_space<vmem>>, vector<64x256xf32>
    tpu.vector_store %arg4[%c0_6, %c0_7], %8 {strides = array<i32>} : memref<64x256xf32, #tpu.memory_space<vmem>>, vector<64x256xf32>,
    return
  }
  func.func @transform_0(%arg0: i32) -> (i32, i32) {
    %c0_i32 = arith.constant 0 : i32
    %c0_i32_0 = arith.constant 0 : i32
    return %arg0, %c0_i32 : i32, i32
  }
  func.func @transform_1(%arg0: i32) -> (i32, i32) {
    %c0_i32 = arith.constant 0 : i32
    %c0_i32_0 = arith.constant 0 : i32
    %c0_i32_1 = arith.constant 0 : i32
    return %c0_i32, %c0_i32_0 : i32, i32
  }
  func.func @transform_2(%arg0: i32) -> (i32, i32) {
    %c0_i32 = arith.constant 0 : i32
    %c0_i32_0 = arith.constant 0 : i32
    return %arg0, %c0_i32 : i32, i32
  }
  func.func @transform_3(%arg0: i32) -> (i32, i32) {
    %c0_i32 = arith.constant 0 : i32
    %c0_i32_0 = arith.constant 0 : i32
    return %arg0, %c0_i32 : i32, i32
  }
}

</mosaic_0001>

<bundles_post_ra>
// kernel: reverse_attention.1
= control target key start
LH: loop header
LB: loop body
LE: loop exit
PB: predicated region body
PF: predicated region fallthrough
CT: control target
= control target key end

     0   :  { %s782_s12 = smov 0   ;;  %s923_s0 = inlined_call_operand.vmem [shape: bf16[128,164], index: 0, kind: input, shape index: {}]   ;;  %s924_s1 = inlined_call_operand.vmem [shape: bf16[164,256], index: 1, kind: input, shape index: {}]   ;;  %s925_s2 = inlined_call_operand.vmem [shape: bf16[128,256], index: 2, kind: input, shape index: {}]   ;;  %s926_s3 = inlined_call_operand.vmem [shape: f32[128,256], index: 3, kind: output, shape index: {}]  }
   0x1 LB: > { %s626_s13 = sadd.s32 4294967295, %s760_s12   ;;  %p630_p0 = scmp.ge.s32.totalorder %s760_s12, 1  ;;  %s760_s12 = sphi %s782_s12, %s13_s12  }
   0x2   : > { %p151_p1 = scmp.lt.s32.totalorder %s760_s12, 3 }
   0x4   : > { %p152_p2 = pnand %p630_p0, %p151_p1 }
   0x5   : > { %v710_v0 = vld [vmem:[%s924_s1 + $0x4] ss:$8 sps:$4 sm:$0xff] (!%p152_p2)   ;;  %s631_s16 = sshll.u32 (!%p152_p2), %s626_s13, 3  ;;  %v712_v1 = vld [vmem:[%s924_s1] ss:$8 sps:$4 sm:$0xff] (!%p152_p2)   ;;  %vm375_vm0 = vcmask (!%p152_p2), 293888  }
   0x6   : > { %155 = sbr.rel (%p152_p2) target bundleno = 280 (0x118), region = 32  ;;  %p184_p3 = scmp.lt.s32.totalorder (!%p152_p2), %s631_s16, 15  ;;  %395 = vmatprep.subr.bf16.mxu0 (!%p152_p2), %v710_v0  ;;  %680 = vmatprep.subr.bf16.mxu1 (!%p152_p2), %v710_v0  ;;  %v713_v2 = vld [vmem:[%s924_s1 + $0x14] ss:$8 sps:$4 sm:$0xff] (!%p152_p2)   ;;  %v715_v3 = vld [vmem:[%s924_s1 + $0x10] ss:$8 sps:$4 sm:$0xff] (!%p152_p2)  }
   0x7   : > { %396 = vmatpush1.bf16.msra.mxu0 (!%p152_p2), %v712_v1  ;;  %691 = vmatpush1.bf16.msra.mxu1 (!%p152_p2), %v712_v1  ;;  %v716_v4 = vld [vmem:[%s924_s1 + $0x24] ss:$8 sps:$4 sm:$0xff] (!%p152_p2)   ;;  %v718_v5 = vld [vmem:[%s924_s1 + $0x20] ss:$8 sps:$4 sm:$0xff] (!%p152_p2)   ;;  %v719_v6 = vld [vmem:[%s924_s1 + $0x34] ss:$8 sps:$4 sm:$0xff] (!%p152_p2)  }
   0x8   : > { %397 = vmatprep.subr.bf16.mxu0 (!%p152_p2), %v713_v2  ;;  %681 = vmatprep.subr.bf16.mxu1 (!%p152_p2), %v713_v2  ;;  %v721_v7 = vld [vmem:[%s924_s1 + $0x30] ss:$8 sps:$4 sm:$0xff] (!%p152_p2)   ;;  %v722_v8 = vld [vmem:[%s924_s1 + $0x44] ss:$8 sps:$4 sm:$0xff] (!%p152_p2)   ;;  %v724_v9 = vld [vmem:[%s924_s1 + $0x40] ss:$8 sps:$4 sm:$0xff] (!%p152_p2)  }
   0x9   : > { %v725_v11 = vld [vmem:[%s924_s1 + $0x54] ss:$8 sps:$4 sm:$0xff] (!%p152_p2)   ;;  %v727_v13 = vld [vmem:[%s924_s1 + $0x50] ss:$8 sps:$4 sm:$0xff] (!%p152_p2)   ;;  %v728_v14 = vld [vmem:[%s924_s1 + $0x64] ss:$8 sps:$4 sm:$0xff] (!%p152_p2)  }
   0xa   : > { %v730_v15 = vld [vmem:[%s924_s1 + $0x60] ss:$8 sps:$4 sm:$0xff] (!%p152_p2)   ;;  %v731_v16 = vld [vmem:[%s924_s1 + $0x74] ss:$8 sps:$4 sm:$0xff] (!%p152_p2)   ;;  %v733_v17 = vld [vmem:[%s924_s1 + $0x70] ss:$8 sps:$4 sm:$0xff] (!%p152_p2)  }
   0xb   : > { %398 = vmatpush1.bf16.msra.mxu0 (!%p152_p2), %v715_v3  ;;  %692 = vmatpush1.bf16.msra.mxu1 (!%p152_p2), %v715_v3  ;;  %v734_v18 = vld [vmem:[%s924_s1 + $0x84] ss:$8 sps:$4 sm:$0xff] (!%p152_p2)   ;;  %v736_v19 = vld [vmem:[%s924_s1 + $0x80] ss:$8 sps:$4 sm:$0xff] (!%p152_p2)   ;;  %v737_v20 = vld [vmem:[%s924_s1 + $0x94] ss:$8 sps:$4 sm:$0xff] (!%p152_p2)  }
   0xc   : > { %399 = vmatprep.subr.bf16.mxu0 (!%p152_p2), %v716_v4  ;;  %682 = vmatprep.subr.bf16.mxu1 (!%p152_p2), %v716_v4  ;;  %v233_v21 = vld [vmem:[%s924_s1 + $0xa0] sm:$0x33] (!%p152_p2)  ;;  %v739_v22 = vld [vmem:[%s924_s1 + $0x90] ss:$8 sps:$4 sm:$0xff] (!%p152_p2)   ;;  %vm388_vm1 = vcmask (!%p152_p2), 1041408  }
   0xd   : > { %s928_s16 = smov (!%p184_p3, %s631_s16), 15  ;;  %v669_v23 = vcombine.high %v233_v21, %v233_v21  ;;  %v668_v24 = vcombine.low %v233_v21, %v233_v21 }
   0xe   : > { %s677_s29 = sshll.u32 %s928_s16, 3 }
   0xf   : > { %400 = vmatpush1.bf16.msra.mxu0 %v718_v5  ;;  %693 = vmatpush1.bf16.msra.mxu1 %v718_v5  ;;  %s822_s7 = scalar_lea.vmem %s923_s0, %s677_s29  ;;  %v390_v25 = vsel %vm388_vm1, %v668_v24, 0  ;;  %s880_s14 = scalar_lea.vmem %s925_s2, %s677_s29 }
  0x10   : > { %401 = vmatprep.subr.bf16.mxu0 %v719_v6  ;;  %683 = vmatprep.subr.bf16.mxu1 %v719_v6  ;;  %v744_v10 = vld [vmem:[%s822_s7 + $0x4] ss:$8 sps:$4 sm:$0xff]   ;;  %v742_v26 = vld [vmem:[%s822_s7] ss:$8 sps:$4 sm:$0xff]   ;;  %v748_v28 = vld [vmem:[%s822_s7 + $0x14] ss:$8 sps:$4 sm:$0xff]  }
  0x11   : > { %v747_v12 = vld [vmem:[%s822_s7 + $0x24] ss:$8 sps:$4 sm:$0xff]   ;;  %671 = vmatprep.mubr.msk.bf16.mxu0 %vm375_vm0, %v744_v10  ;;  %v745_v27 = vld [vmem:[%s822_s7 + $0x20] ss:$8 sps:$4 sm:$0xff]   ;;  %v750_v29 = vld [vmem:[%s822_s7 + $0x34] ss:$8 sps:$4 sm:$0xff]  }
  0x12   : > { %673 = vmatprep.mubr.msk.bf16.mxu1 %vm375_vm0, %v747_v12  ;;  %v752_v30 = vld [vmem:[%s822_s7 + $0x10] ss:$8 sps:$4 sm:$0xff]   ;;  %v468_v32 = vld [vmem:[%s880_s14] sm:$0xff]  ;;  %v469_v34 = vld [vmem:[%s880_s14 + $0x8] sm:$0xff]  ;;  %s679_s29 = sshll.u32 %s928_s16, 4 }
  0x13   : > { %402 = vmatpush1.bf16.msra.mxu0 %v721_v7  ;;  %694 = vmatpush1.bf16.msra.mxu1 %v721_v7  ;;  %v753_v31 = vld [vmem:[%s822_s7 + $0x30] ss:$8 sps:$4 sm:$0xff]   ;;  %v472_v33 = vld [vmem:[%s880_s14 + $0x20] sm:$0xff]  ;;  %v473_v35 = vld [vmem:[%s880_s14 + $0x28] sm:$0xff]  ;;  %v476_v36 = vunpack.c.l.bf16 %v468_v32  ;;  %v477_v38 = vunpack.c.h.bf16 %v468_v32  ;;  %v478_v42 = vunpack.c.l.bf16 %v469_v34  ;;  %v479_v46 = vunpack.c.h.bf16 %v469_v34  ;;  %s900_s15 = scalar_lea.vmem %s926_s3, %s679_s29 }
  0x14   : > { %403 = vmatprep.subr.bf16.mxu0 %v722_v8  ;;  %684 = vmatprep.subr.bf16.mxu1 %v722_v8  ;;  %v484_v37 = vunpack.c.l.bf16 %v472_v33  ;;  %v485_v39 = vunpack.c.h.bf16 %v472_v33  ;;  %v887_v40 = vld [vmem:[%s880_s14 + $0x10] sm:$0xff]  ;;  %v486_v43 = vunpack.c.l.bf16 %v473_v35  ;;  %v487_v47 = vunpack.c.h.bf16 %v473_v35  ;;  %v471_v6 = vld [vmem:[%s880_s14 + $0x18] sm:$0xff] }
  0x15   : > { %v890_v41 = vld [vmem:[%s880_s14 + $0x30] sm:$0xff]  ;;  %v480_v52 = vunpack.c.l.bf16 %v887_v40  ;;  %v481_v58 = vunpack.c.h.bf16 %v887_v40  ;;  %v475_v7 = vld [vmem:[%s880_s14 + $0x38] sm:$0xff]  ;;  %v483_v24 = vunpack.c.h.bf16 %v471_v6 }
  0x16   : > { %v488_v53 = vunpack.c.l.bf16 %v890_v41  ;;  %v489_v59 = vunpack.c.h.bf16 %v890_v41 }
  0x17   : > { %404 = vmatpush1.bf16.msra.mxu0 %v724_v9  ;;  %695 = vmatpush1.bf16.msra.mxu1 %v724_v9 }
  0x18   : > { %405 = vmatprep.subr.bf16.mxu0 %v725_v11  ;;  %685 = vmatprep.subr.bf16.mxu1 %v725_v11 }
  0x1b   : > { %406 = vmatpush1.bf16.msra.mxu0 %v727_v13  ;;  %696 = vmatpush1.bf16.msra.mxu1 %v727_v13 }
  0x1c   : > { %407 = vmatprep.subr.bf16.mxu0 %v728_v14  ;;  %686 = vmatprep.subr.bf16.mxu1 %v728_v14 }
  0x1f   : > { %408 = vmatpush1.bf16.msra.mxu0 %v730_v15  ;;  %697 = vmatpush1.bf16.msra.mxu1 %v730_v15 }
  0x20   : > { %409 = vmatprep.subr.bf16.mxu0 %v731_v16  ;;  %687 = vmatprep.subr.bf16.mxu1 %v731_v16 }
  0x23   : > { %410 = vmatpush1.bf16.msra.mxu0 %v733_v17  ;;  %698 = vmatpush1.bf16.msra.mxu1 %v733_v17 }
  0x24   : > { %411 = vmatprep.subr.bf16.mxu0 %v734_v18  ;;  %688 = vmatprep.subr.bf16.mxu1 %v734_v18  ;;  %v482_v18 = vunpack.c.l.bf16 %v471_v6 }
  0x27   : > { %412 = vmatpush1.bf16.msra.mxu0 %v736_v19  ;;  %699 = vmatpush1.bf16.msra.mxu1 %v736_v19  ;;  %v490_v19 = vunpack.c.l.bf16 %v475_v7 }
  0x28   : > { %413 = vmatprep.subr.bf16.mxu0 %v737_v20  ;;  %689 = vmatprep.subr.bf16.mxu1 %v737_v20 }
  0x2b   : > { %414 = vmatpush1.bf16.msra.mxu0 %v739_v22  ;;  %700 = vmatpush1.bf16.msra.mxu1 %v739_v22 }
  0x2c   : > { %670 = vmatprep.subr.msk.bf16.mxu0 %vm388_vm1, %v669_v23  ;;  %690 = vmatprep.subr.msk.bf16.mxu1 %vm388_vm1, %v669_v23 }
  0x2f   : > { %416 = vmatpush1.bf16.msra.mxu0 %v390_v25  ;;  %701 = vmatpush1.bf16.msra.mxu1 %v390_v25  ;;  %v491_v25 = vunpack.c.h.bf16 %v475_v7 }
  0x32   : > { %428 = vmatmul.mubr.bf16.vlgmr.msra.gmra.mrb[0].mxu0 %v742_v26  ;;  %448 = vmatmul.mubr.bf16.vlgmr.msra.gmra.mrb[0].mxu1 %v745_v27 }
  0x33   : > { %672 = vmatprep.mubr.msk.bf16.mxu0 %vm375_vm0, %v748_v28  ;;  %674 = vmatprep.mubr.msk.bf16.mxu1 %vm375_vm0, %v750_v29 }
  0x3a   : > { %438 = vmatmul.mubr.bf16.gmra.mrb[4].mxu0 %v752_v30  ;;  %458 = vmatmul.mubr.bf16.gmra.mrb[4].mxu1 %v753_v31 }
 0x105   : > { %v429_v44 = vpop.f32.mrb[0].mxu0  ;;  %v449_v45 = vpop.f32.mrb[0].mxu1 }
 0x106   : > { %v492_v48 = vmul.f32 %v476_v36, %v429_v44  ;;  %v500_v49 = vmul.f32 %v484_v37, %v449_v45  ;;  %v431_v50 = vpop.f32.mrb[1].mxu0  ;;  %v451_v51 = vpop.f32.mrb[1].mxu1 }
 0x107   : > { %v493_v54 = vmul.f32 %v477_v38, %v431_v50  ;;  %v501_v55 = vmul.f32 %v485_v39, %v451_v51  ;;  %v433_v56 = vpop.f32.mrb[2].mxu0  ;;  %v453_v57 = vpop.f32.mrb[2].mxu1 }
 0x108   : > { %v508_v60 = vmul.f32 0.2, %v492_v48  ;;  %v516_v61 = vmul.f32 0.2, %v500_v49  ;;  %v494_v62 = vmul.f32 %v478_v42, %v433_v56  ;;  %v502_v63 = vmul.f32 %v486_v43, %v453_v57  ;;  %v435_v0 = vpop.f32.mrb[3].mxu0  ;;  %v455_v1 = vpop.f32.mrb[3].mxu1 }
 0x109   : > { %v509_v2 = vmul.f32 0.2, %v493_v54  ;;  %v517_v3 = vmul.f32 0.2, %v501_v55  ;;  %v495_v4 = vmul.f32 %v479_v46, %v435_v0  ;;  %v503_v5 = vmul.f32 %v487_v47, %v455_v1 }
 0x10a   : > { %v524_v8 = vmax.f32 %v492_v48, %v508_v60  ;;  %v532_v9 = vmax.f32 %v500_v49, %v516_v61  ;;  %v510_v10 = vmul.f32 0.2, %v494_v62  ;;  %v518_v11 = vmul.f32 0.2, %v502_v63 }
 0x10b   : > { %v525_v12 = vmax.f32 %v493_v54, %v509_v2  ;;  %v533_v13 = vmax.f32 %v501_v55, %v517_v3  ;;  %v511_v14 = vmul.f32 0.2, %v495_v4  ;;  %v519_v15 = vmul.f32 0.2, %v503_v5 }
 0x10c   : > { %540 = vst [vmem:[%s900_s15] sm:$0xff] %v524_v8  ;;  %548 = vst [vmem:[%s900_s15 + $0x40] sm:$0xff] %v532_v9  ;;  %v526_v16 = vmax.f32 %v494_v62, %v510_v10  ;;  %v534_v17 = vmax.f32 %v502_v63, %v518_v11 }
 0x10d   : > { %541 = vst [vmem:[%s900_s15 + $0x8] sm:$0xff] %v525_v12  ;;  %549 = vst [vmem:[%s900_s15 + $0x48] sm:$0xff] %v533_v13  ;;  %v527_v20 = vmax.f32 %v495_v4, %v511_v14  ;;  %v535_v21 = vmax.f32 %v503_v5, %v519_v15  ;;  %v439_v22 = vpop.f32.mrb[4].mxu0  ;;  %v459_v23 = vpop.f32.mrb[4].mxu1 }
 0x10e   : > { %542 = vst [vmem:[%s900_s15 + $0x10] sm:$0xff] %v526_v16  ;;  %550 = vst [vmem:[%s900_s15 + $0x50] sm:$0xff] %v534_v17  ;;  %v496_v26 = vmul.f32 %v480_v52, %v439_v22  ;;  %v504_v27 = vmul.f32 %v488_v53, %v459_v23  ;;  %v441_v28 = vpop.f32.mrb[5].mxu0  ;;  %v461_v29 = vpop.f32.mrb[5].mxu1 }
 0x10f   : > { %543 = vst [vmem:[%s900_s15 + $0x18] sm:$0xff] %v527_v20  ;;  %551 = vst [vmem:[%s900_s15 + $0x58] sm:$0xff] %v535_v21  ;;  %v497_v30 = vmul.f32 %v481_v58, %v441_v28  ;;  %v505_v31 = vmul.f32 %v489_v59, %v461_v29  ;;  %v443_v32 = vpop.f32.mrb[6].mxu0  ;;  %v463_v33 = vpop.f32.mrb[6].mxu1 }
 0x110   : > { %v512_v34 = vmul.f32 0.2, %v496_v26  ;;  %v520_v35 = vmul.f32 0.2, %v504_v27  ;;  %v498_v36 = vmul.f32 %v482_v18, %v443_v32  ;;  %v506_v37 = vmul.f32 %v490_v19, %v463_v33  ;;  %v445_v38 = vpop.f32.mrb[7].mxu0  ;;  %v465_v39 = vpop.f32.mrb[7].mxu1 }
 0x111   : > { %v513_v40 = vmul.f32 0.2, %v497_v30  ;;  %v521_v41 = vmul.f32 0.2, %v505_v31  ;;  %v499_v42 = vmul.f32 %v483_v24, %v445_v38  ;;  %v507_v43 = vmul.f32 %v491_v25, %v465_v39 }
 0x112   : > { %v528_v44 = vmax.f32 %v496_v26, %v512_v34  ;;  %v536_v45 = vmax.f32 %v504_v27, %v520_v35  ;;  %v514_v46 = vmul.f32 0.2, %v498_v36  ;;  %v522_v47 = vmul.f32 0.2, %v506_v37 }
 0x113   : > { %v529_v48 = vmax.f32 %v497_v30, %v513_v40  ;;  %v537_v49 = vmax.f32 %v505_v31, %v521_v41  ;;  %v515_v50 = vmul.f32 0.2, %v499_v42  ;;  %v523_v51 = vmul.f32 0.2, %v507_v43 }
 0x114   : > { %544 = vst [vmem:[%s900_s15 + $0x20] sm:$0xff] %v528_v44  ;;  %552 = vst [vmem:[%s900_s15 + $0x60] sm:$0xff] %v536_v45  ;;  %v530_v52 = vmax.f32 %v498_v36, %v514_v46  ;;  %v538_v53 = vmax.f32 %v506_v37, %v522_v47 }
 0x115   : > { %545 = vst [vmem:[%s900_s15 + $0x28] sm:$0xff] %v529_v48  ;;  %553 = vst [vmem:[%s900_s15 + $0x68] sm:$0xff] %v537_v49  ;;  %v531_v54 = vmax.f32 %v499_v42, %v515_v50  ;;  %v539_v55 = vmax.f32 %v507_v43, %v523_v51 }
 0x116   : > { %546 = vst [vmem:[%s900_s15 + $0x30] sm:$0xff] %v530_v52  ;;  %554 = vst [vmem:[%s900_s15 + $0x70] sm:$0xff] %v538_v53 }
 0x117   : > { %547 = vst [vmem:[%s900_s15 + $0x38] sm:$0xff] %v531_v54  ;;  %555 = vst [vmem:[%s900_s15 + $0x78] sm:$0xff] %v539_v55 }
 0x118 PF: > { %s13_s12 = sadd.s32 1, %s760_s12  }
 0x119   : > { %p10_p4 = scmp.ge.s32.totalorder %s13_s12, 4  }
 0x11b   :  { %12 = sbr.rel (!%p10_p4) target bundleno = 1 (0x1), region = 65 }

</bundles_post_ra>
